<compile_context>
chip_gen: v5e
topology: v5e:2x2
jax: 0.10.0
libtpu: 0.0.40
codegen_flags: <defaults>
</compile_context>

<pallas_src>
import functools

import jax
import jax.numpy as jnp
from jax.experimental import pallas as pl
from jax.experimental.pallas import tpu as pltpu


# --------------------------------------------------------------------------------------
# Helpers
# --------------------------------------------------------------------------------------
def _full_spec(shape):
    """Whole-array VMEM block for a grid=(1,) kernel."""
    return pl.BlockSpec(shape, lambda *_: (0,) * len(shape))


# --------------------------------------------------------------------------------------
# Pallas kernels
# --------------------------------------------------------------------------------------
def _linear_kernel(*refs, apply_relu, has_bias):
    """y = x @ w (+ b) (optionally ReLU)."""
    if has_bias:
        x_ref, w_ref, b_ref, o_ref = refs
    else:
        x_ref, w_ref, o_ref = refs
        b_ref = None
    y = jnp.dot(x_ref[...], w_ref[...], preferred_element_type=jnp.float32)
    if has_bias:
        y = y + b_ref[...]
    if apply_relu:
        y = jnp.maximum(y, 0.0)
    o_ref[...] = y.astype(o_ref.dtype)


def pallas_linear(x, w, b=None, relu=False):
    """x:(M,K) float32, w:(K,N) float32, b:(N,) or None."""
    M, K = x.shape
    K2, N = w.shape
    assert K == K2
    has_bias = b is not None
    args = [x.astype(jnp.float32), w.astype(jnp.float32)]
    in_specs = [_full_spec((M, K)), _full_spec((K, N))]
    if has_bias:
        args.append(b.reshape(1, N).astype(jnp.float32))
        in_specs.append(_full_spec((1, N)))
    return pl.pallas_call(
        functools.partial(_linear_kernel, apply_relu=relu, has_bias=has_bias),
        out_shape=jax.ShapeDtypeStruct((M, N), jnp.float32),
        grid=(1,),
        in_specs=in_specs,
        out_specs=_full_spec((M, N)),
    )(*args)


def _gat_fused_kernel(h_ref, wc_ref, a2_ref, ew_ref, c_ref, o_ref):
    """Fully fused My_GATLayer (eval mode, att_ew=True, relu=True, residual).

    h   : (N, F)      input node features
    wc  : (F, 2F)     [W_self^T | W_func^T] merged weight
    a2  : (2, F)      rows = (a_src, a_dst) split of attention_func.weight
    ew  : (2, N, N)   raw edge weights e_w, oriented [dst, src]
    c   : (2,) SMEM   (sum(a_e[:half]), sum(a_e[half:])) -- closed form of
                      ReplicationPad1d(hidden//2-1)(e_w) dotted with a_e
    out : (N, F)      h + relu(h_s + sum_u softmax_u(e) * z_u)
    """
    F = a2_ref.shape[1]
    h = h_ref[...]
    # merged (N,F)@(F,2F) matmul -> lane-dense 2F output; slice h_s / z from it
    hz = jnp.dot(h, wc_ref[...], preferred_element_type=jnp.float32)     # (N, 2F)
    h_s = hz[:, :F]
    z = hz[:, F:]
    a2 = a2_ref[...]
    # per-node score pieces on the MXU (q @ k^T pattern), results land in the
    # layouts the (dst, src) score matrix needs -- no transposes.
    dn = (((1,), (1,)), ((), ()))                                         # contract feature dim
    ssrc = jax.lax.dot_general(a2[0:1, :], z, dn,
                               preferred_element_type=jnp.float32)        # (1, N) per source u
    sdst = jax.lax.dot_general(z, a2[1:2, :], dn,
                               preferred_element_type=jnp.float32)        # (N, 1) per dest v
    # edge score, closed form of the replication-padded edge feature (VPU axpy)
    se = c_ref[0] * ew_ref[0] + c_ref[1] * ew_ref[1]                      # (N, N) [dst, src]
    # scores[v, u] = leaky_relu(a_src.z_u + a_dst.z_v + a_e.w_uv)
    scores = sdst + ssrc + se
    scores = jnp.where(scores > 0, scores, 0.01 * scores)                 # F.leaky_relu, 0.01
    # softmax over incoming edges (axis = source nodes u, last axis)
    m = jnp.max(scores, axis=-1, keepdims=True)
    p = jnp.exp(scores - m)
    attn = p * pl.reciprocal(jnp.sum(p, axis=-1, keepdims=True), approx=True)
    # aggregate messages: (N_dst, N_src) @ (N_src, F)
    agg = jnp.dot(attn, z, preferred_element_type=jnp.float32)
    o_ref[...] = (h + jnp.maximum(h_s + agg, 0.0)).astype(o_ref.dtype)    # relu + residual


def _encoder_kernel(p_ref, cw_ref, cb_ref, pool_ref, lw_ref, lb_ref,
                    f_ref, we_ref, be_ref, o_ref):
    """Fused map encoder + node-history embedding.

    conv-as-matmul + ReLU, global-avg-pool as a block-diagonal matmul, map linear,
    node embedding linear, and the final concat -- one kernel, one HBM output.
    """
    conv = jnp.dot(p_ref[...], cw_ref[...], preferred_element_type=jnp.float32) + cb_ref[...]
    conv = jnp.maximum(conv, 0.0)                                              # (N*P, Cout)
    pooled = jnp.dot(pool_ref[...], conv, preferred_element_type=jnp.float32)  # (N, Cout)
    maps_emb = (jnp.dot(pooled, lw_ref[...], preferred_element_type=jnp.float32)
                + lb_ref[...])                                                 # (N, hidden)
    h_emb = (jnp.dot(f_ref[...], we_ref[...], preferred_element_type=jnp.float32)
             + be_ref[...])                                                    # (N, hidden)
    hid = maps_emb.shape[-1]
    o_ref[:, :hid] = maps_emb.astype(o_ref.dtype)    # h = concat([maps_emb, h_emb], -1)
    o_ref[:, hid:] = h_emb.astype(o_ref.dtype)


# --------------------------------------------------------------------------------------
# Model pieces (glue orchestrating Pallas calls)
# --------------------------------------------------------------------------------------
def gat_layer_fused(h, ew_t, params):
    """My_GATLayer forward (eval mode, att_ew=True, relu=True, residual) -- one kernel."""
    N, F_in = h.shape
    F_out = params["w_self"].shape[0]
    # merged node-feature weight: h @ [Ws^T | Wf^T]
    w_comb = jnp.concatenate([params["w_self"].T, params["w_func"].T], axis=1)  # (F_in, 2F)
    w_att = params["w_att"].astype(jnp.float32)              # (1, 2F + e_dims)
    a2 = w_att[0, : 2 * F_out].reshape(2, F_out)              # rows = (a_src, a_dst)
    a_e = w_att[0, 2 * F_out:]                                 # (e_dims,)
    half = a_e.shape[0] // 2                                   # = pad+1 copies per e_w column
    c = jnp.stack([jnp.sum(a_e[:half]), jnp.sum(a_e[half:])]).astype(jnp.float32)  # (2,)
    return pl.pallas_call(
        _gat_fused_kernel,
        out_shape=jax.ShapeDtypeStruct((N, F_out), jnp.float32),
        grid=(1,),
        in_specs=[
            _full_spec((N, F_in)),
            _full_spec((F_in, 2 * F_out)),
            _full_spec((2, F_out)),
            _full_spec((2, N, N)),
            pl.BlockSpec(memory_space=pltpu.MemorySpace.SMEM),
        ],
        out_specs=_full_spec((N, F_out)),
    )(h.astype(jnp.float32), w_comb.astype(jnp.float32), a2,
      ew_t.astype(jnp.float32), c)


def encode_nodes(feats_flat, maps, params):
    """Fused (simplified) map feature extractor + node embedding -> h0 = (N, 2*hidden)."""
    N, Cin, H, W = maps.shape
    K, S, P = 3, 2, 1
    OH, OW = H // S, W // S
    mp = params["map"]
    Cout = mp["conv_w"].shape[0]
    hidden = mp["lin_w"].shape[0]
    emb_dim = params["emb_w"].shape[0]
    in_dim = feats_flat.shape[1]
    # im2col (glue): NCHW -> (N*OH*OW, Cin*K*K)
    xp = jnp.pad(maps, ((0, 0), (0, 0), (P, P), (P, P)))
    cols = []
    for ki in range(K):
        for kj in range(K):
            cols.append(xp[:, :, ki:ki + S * OH:S, kj:kj + S * OW:S])   # (N,Cin,OH,OW)
    patches = jnp.stack(cols, axis=-1)                                   # (N,Cin,OH,OW,K*K)
    patches = patches.transpose(0, 2, 3, 1, 4).reshape(N * OH * OW, Cin * K * K)
    w_conv = mp["conv_w"].reshape(Cout, Cin * K * K).T                   # (Cin*K*K, Cout)
    # block-diagonal mean-pool matrix so global-avg-pool runs on the (idle) MXU in-kernel
    pool = jnp.repeat(jnp.eye(N, dtype=jnp.float32), OH * OW, axis=1) / float(OH * OW)
    NP, KK = N * OH * OW, Cin * K * K
    return pl.pallas_call(
        _encoder_kernel,
        out_shape=jax.ShapeDtypeStruct((N, hidden + emb_dim), jnp.float32),
        grid=(1,),
        in_specs=[
            _full_spec((NP, KK)),
            _full_spec((KK, Cout)),
            _full_spec((1, Cout)),
            _full_spec((N, NP)),
            _full_spec((Cout, hidden)),
            _full_spec((1, hidden)),
            _full_spec((N, in_dim)),
            _full_spec((in_dim, emb_dim)),
            _full_spec((1, emb_dim)),
        ],
        out_specs=_full_spec((N, hidden + emb_dim)),
    )(patches.astype(jnp.float32),
      w_conv.astype(jnp.float32),
      mp["conv_b"].reshape(1, Cout).astype(jnp.float32),
      pool,
      mp["lin_w"].T.astype(jnp.float32),
      mp["lin_b"].reshape(1, hidden).astype(jnp.float32),
      feats_flat.astype(jnp.float32),
      params["emb_w"].T.astype(jnp.float32),
      params["emb_b"].reshape(1, emb_dim).astype(jnp.float32))


def scout_forward(params, feats, e_w, maps, n_nodes):
    # feats.view(N, -1) -> embedding; map encoder; concat -- all in one fused kernel
    feats_flat = feats.reshape(feats.shape[0], -1)
    h = encode_nodes(feats_flat, maps, params)                      # (N, 2*hidden)
    # Dense fully-connected graph: edge u->v lives at row u*N + v.
    # ew_t[k, v, u] = e_w[u*N + v, k]  (oriented [dst, src]); shared by both GAT layers.
    ew_t = e_w.reshape(n_nodes, n_nodes, 2).transpose(2, 1, 0).astype(jnp.float32)
    h = gat_layer_fused(h, ew_t, params["gat1"])
    h = gat_layer_fused(h, ew_t, params["gat2"])
    # dropout_l is identity at inference
    y = pallas_linear(h, params["lin1_w"].T, params["lin1_b"])       # (N, out_dim)
    return y


# --------------------------------------------------------------------------------------
# Deterministic parameter init
# --------------------------------------------------------------------------------------
def init_params(key, input_dim, hidden_dim, output_dim, conv_cout=8):
    hidden_dims = 2 * hidden_dim
    e_dims = (hidden_dim // 2) * 2
    ks = jax.random.split(key, 16)
    nrm = lambda k, shape, fan_in: (jax.random.normal(k, shape, jnp.float32)
                                    / jnp.sqrt(jnp.float32(fan_in)))
    params = {
        "emb_w": nrm(ks[0], (hidden_dim, input_dim), input_dim),
        "emb_b": jnp.zeros((hidden_dim,), jnp.float32),
        "map": {
            "conv_w": nrm(ks[1], (conv_cout, 1, 3, 3), 9),
            "conv_b": jnp.zeros((conv_cout,), jnp.float32),
            "lin_w": nrm(ks[2], (hidden_dim, conv_cout), conv_cout),
            "lin_b": jnp.zeros((hidden_dim,), jnp.float32),
        },
        "gat1": {
            "w_self": nrm(ks[3], (hidden_dims, hidden_dims), hidden_dims),
            "w_func": nrm(ks[4], (hidden_dims, hidden_dims), hidden_dims),
            "w_att": nrm(ks[5], (1, 2 * hidden_dims + e_dims), 2 * hidden_dims + e_dims),
        },
        "gat2": {
            "w_self": nrm(ks[6], (hidden_dims, hidden_dims), hidden_dims),
            "w_func": nrm(ks[7], (hidden_dims, hidden_dims), hidden_dims),
            "w_att": nrm(ks[8], (1, 2 * hidden_dims + e_dims), 2 * hidden_dims + e_dims),
        },
        "lin1_w": nrm(ks[9], (output_dim, hidden_dims), hidden_dims),
        "lin1_b": jnp.zeros((output_dim,), jnp.float32),
    }
    return params


# --------------------------------------------------------------------------------------
# Main
# --------------------------------------------------------------------------------------
if __name__ == "__main__":
    N_NODES = 8          # nodes in the (dense, fully connected) graph
    T, FI = 4, 6         # feats are (N, T, FI) -> flattened to input_dim
    INPUT_DIM = T * FI
    HIDDEN_DIM = 32
    OUTPUT_DIM = 12
    H = W = 16           # map raster size (NCHW, single channel)

    key = jax.random.PRNGKey(0)
    k_feat, k_ew, k_map, k_param = jax.random.split(key, 4)

    feats = jax.random.normal(k_feat, (N_NODES, T, FI), jnp.float32)
    e_w = jax.random.uniform(k_ew, (N_NODES * N_NODES, 2), jnp.float32)   # edge u*N+v
    maps = jax.random.normal(k_map, (N_NODES, 1, H, W), jnp.float32)      # NCHW
    params = init_params(k_param, INPUT_DIM, HIDDEN_DIM, OUTPUT_DIM)

    fwd = jax.jit(functools.partial(scout_forward, n_nodes=N_NODES))
    y = fwd(params, feats, e_w, maps)
    y = jax.block_until_ready(y)
    assert y.shape == (N_NODES, OUTPUT_DIM)
    assert bool(jnp.all(jnp.isfinite(y)))
    print("KERNEL_OK")
</pallas_src>

<mosaic_0001>
module attributes {stable_mosaic.version = 11 : i64} {
  func.func @_encoder_kernel(%arg0: i32, %arg1: memref<512x9xf32, #tpu.memory_space<vmem>>, %arg2: memref<9x8xf32, #tpu.memory_space<vmem>>, %arg3: memref<1x8xf32, #tpu.memory_space<vmem>>, %arg4: memref<8x512xf32, #tpu.memory_space<vmem>>, %arg5: memref<8x32xf32, #tpu.memory_space<vmem>>, %arg6: memref<1x32xf32, #tpu.memory_space<vmem>>, %arg7: memref<8x24xf32, #tpu.memory_space<vmem>>, %arg8: memref<24x32xf32, #tpu.memory_space<vmem>>, %arg9: memref<1x32xf32, #tpu.memory_space<vmem>>, %arg10: memref<8x64xf32, #tpu.memory_space<vmem>>) attributes {dimension_semantics = [#tpu.dimension_semantics<arbitrary>], iteration_bounds = array<i64: 1>, scalar_prefetch = 0 : i64, scratch_operands = 0 : i64, tpu.core_type = #tpu.core_type<tc>, window_params = [{pipeline_mode = #tpu.pipeline_mode<synchronous>, transform_indices = @transform_0, window_bounds = array<i64: 512, 9>}, {pipeline_mode = #tpu.pipeline_mode<synchronous>, transform_indices = @transform_1, window_bounds = array<i64: 9, 8>}, {pipeline_mode = #tpu.pipeline_mode<synchronous>, transform_indices = @transform_2, window_bounds = array<i64: 1, 8>}, {pipeline_mode = #tpu.pipeline_mode<synchronous>, transform_indices = @transform_3, window_bounds = array<i64: 8, 512>}, {pipeline_mode = #tpu.pipeline_mode<synchronous>, transform_indices = @transform_4, window_bounds = array<i64: 8, 32>}, {pipeline_mode = #tpu.pipeline_mode<synchronous>, transform_indices = @transform_5, window_bounds = array<i64: 1, 32>}, {pipeline_mode = #tpu.pipeline_mode<synchronous>, transform_indices = @transform_6, window_bounds = array<i64: 8, 24>}, {pipeline_mode = #tpu.pipeline_mode<synchronous>, transform_indices = @transform_7, window_bounds = array<i64: 24, 32>}, {pipeline_mode = #tpu.pipeline_mode<synchronous>, transform_indices = @transform_8, window_bounds = array<i64: 1, 32>}, {pipeline_mode = #tpu.pipeline_mode<synchronous>, transform_indices = @transform_9, window_bounds = array<i64: 8, 64>}]} {
    %c0 = arith.constant 0 : index
    %c0_0 = arith.constant 0 : index
    %0 = vector.load %arg1[%c0, %c0_0] : memref<512x9xf32, #tpu.memory_space<vmem>>, vector<512x9xf32>
    %c0_1 = arith.constant 0 : index
    %c0_2 = arith.constant 0 : index
    %1 = vector.load %arg2[%c0_1, %c0_2] : memref<9x8xf32, #tpu.memory_space<vmem>>, vector<9x8xf32>
    %cst = arith.constant dense<0.000000e+00> : vector<512x8xf32>
    %2 = tpu.matmul %0, %1, %cst {dimension_numbers = #tpu.dot_dimension_numbers<[1], [0], [0], [1], [0, 0, 1, 1], [], []>} : vector<512x9xf32>, vector<9x8xf32>, vector<512x8xf32> -> vector<512x8xf32>
    %c0_3 = arith.constant 0 : index
    %c0_4 = arith.constant 0 : index
    %3 = vector.load %arg3[%c0_3, %c0_4] : memref<1x8xf32, #tpu.memory_space<vmem>>, vector<1x8xf32>
    %4 = vector.broadcast %3 : vector<1x8xf32> to vector<512x8xf32>
    %5 = arith.addf %2, %4 : vector<512x8xf32>
    %cst_5 = arith.constant 0.000000e+00 : f32
    %6 = vector.broadcast %cst_5 : f32 to vector<512x8xf32>
    %7 = arith.maximumf %5, %6 : vector<512x8xf32>
    %c0_6 = arith.constant 0 : index
    %c0_7 = arith.constant 0 : index
    %8 = vector.load %arg4[%c0_6, %c0_7] : memref<8x512xf32, #tpu.memory_space<vmem>>, vector<8x512xf32>
    %cst_8 = arith.constant dense<0.000000e+00> : vector<8x8xf32>
    %9 = tpu.matmul %8, %7, %cst_8 {dimension_numbers = #tpu.dot_dimension_numbers<[1], [0], [0], [1], [0, 0, 1, 1], [], []>} : vector<8x512xf32>, vector<512x8xf32>, vector<8x8xf32> -> vector<8x8xf32>
    %c0_9 = arith.constant 0 : index
    %c0_10 = arith.constant 0 : index
    %10 = vector.load %arg5[%c0_9, %c0_10] : memref<8x32xf32, #tpu.memory_space<vmem>>, vector<8x32xf32>
    %cst_11 = arith.constant dense<0.000000e+00> : vector<8x32xf32>
    %11 = tpu.matmul %9, %10, %cst_11 {dimension_numbers = #tpu.dot_dimension_numbers<[1], [0], [0], [1], [0, 0, 1, 1], [], []>} : vector<8x8xf32>, vector<8x32xf32>, vector<8x32xf32> -> vector<8x32xf32>
    %c0_12 = arith.constant 0 : index
    %c0_13 = arith.constant 0 : index
    %12 = vector.load %arg6[%c0_12, %c0_13] : memref<1x32xf32, #tpu.memory_space<vmem>>, vector<1x32xf32>
    %13 = vector.broadcast %12 : vector<1x32xf32> to vector<8x32xf32>
    %14 = arith.addf %11, %13 : vector<8x32xf32>
    %c0_14 = arith.constant 0 : index
    %c0_15 = arith.constant 0 : index
    %15 = vector.load %arg7[%c0_14, %c0_15] : memref<8x24xf32, #tpu.memory_space<vmem>>, vector<8x24xf32>
    %c0_16 = arith.constant 0 : index
    %c0_17 = arith.constant 0 : index
    %16 = vector.load %arg8[%c0_16, %c0_17] : memref<24x32xf32, #tpu.memory_space<vmem>>, vector<24x32xf32>
    %cst_18 = arith.constant dense<0.000000e+00> : vector<8x32xf32>
    %17 = tpu.matmul %15, %16, %cst_18 {dimension_numbers = #tpu.dot_dimension_numbers<[1], [0], [0], [1], [0, 0, 1, 1], [], []>} : vector<8x24xf32>, vector<24x32xf32>, vector<8x32xf32> -> vector<8x32xf32>
    %c0_19 = arith.constant 0 : index
    %c0_20 = arith.constant 0 : index
    %18 = vector.load %arg9[%c0_19, %c0_20] : memref<1x32xf32, #tpu.memory_space<vmem>>, vector<1x32xf32>
    %19 = vector.broadcast %18 : vector<1x32xf32> to vector<8x32xf32>
    %20 = arith.addf %17, %19 : vector<8x32xf32>
    %c0_21 = arith.constant 0 : index
    %c0_22 = arith.constant 0 : index
    %21 = vector.load %arg10[%c0_21, %c0_22] : memref<8x64xf32, #tpu.memory_space<vmem>>, vector<8x32xf32>
    tpu.vector_store %arg10[%c0_21, %c0_22], %14 {strides = array<i32>} : memref<8x64xf32, #tpu.memory_space<vmem>>, vector<8x32xf32>,
    %c0_23 = arith.constant 0 : index
    %c32 = arith.constant 32 : index
    %22 = vector.load %arg10[%c0_23, %c32] : memref<8x64xf32, #tpu.memory_space<vmem>>, vector<8x32xf32>
    tpu.vector_store %arg10[%c0_23, %c32], %20 {strides = array<i32>} : memref<8x64xf32, #tpu.memory_space<vmem>>, vector<8x32xf32>,
    return
  }
  func.func @transform_0(%arg0: i32) -> (i32, i32) {
    %c0_i32 = arith.constant 0 : i32
    %c0_i32_0 = arith.constant 0 : i32
    %c0_i32_1 = arith.constant 0 : i32
    return %c0_i32, %c0_i32_0 : i32, i32
  }
  func.func @transform_1(%arg0: i32) -> (i32, i32) {
    %c0_i32 = arith.constant 0 : i32
    %c0_i32_0 = arith.constant 0 : i32
    %c0_i32_1 = arith.constant 0 : i32
    return %c0_i32, %c0_i32_0 : i32, i32
  }
  func.func @transform_2(%arg0: i32) -> (i32, i32) {
    %c0_i32 = arith.constant 0 : i32
    %c0_i32_0 = arith.constant 0 : i32
    %c0_i32_1 = arith.constant 0 : i32
    return %c0_i32, %c0_i32_0 : i32, i32
  }
  func.func @transform_3(%arg0: i32) -> (i32, i32) {
    %c0_i32 = arith.constant 0 : i32
    %c0_i32_0 = arith.constant 0 : i32
    %c0_i32_1 = arith.constant 0 : i32
    return %c0_i32, %c0_i32_0 : i32, i32
  }
  func.func @transform_4(%arg0: i32) -> (i32, i32) {
    %c0_i32 = arith.constant 0 : i32
    %c0_i32_0 = arith.constant 0 : i32
    %c0_i32_1 = arith.constant 0 : i32
    return %c0_i32, %c0_i32_0 : i32, i32
  }
  func.func @transform_5(%arg0: i32) -> (i32, i32) {
    %c0_i32 = arith.constant 0 : i32
    %c0_i32_0 = arith.constant 0 : i32
    %c0_i32_1 = arith.constant 0 : i32
    return %c0_i32, %c0_i32_0 : i32, i32
  }
  func.func @transform_6(%arg0: i32) -> (i32, i32) {
    %c0_i32 = arith.constant 0 : i32
    %c0_i32_0 = arith.constant 0 : i32
    %c0_i32_1 = arith.constant 0 : i32
    return %c0_i32, %c0_i32_0 : i32, i32
  }
  func.func @transform_7(%arg0: i32) -> (i32, i32) {
    %c0_i32 = arith.constant 0 : i32
    %c0_i32_0 = arith.constant 0 : i32
    %c0_i32_1 = arith.constant 0 : i32
    return %c0_i32, %c0_i32_0 : i32, i32
  }
  func.func @transform_8(%arg0: i32) -> (i32, i32) {
    %c0_i32 = arith.constant 0 : i32
    %c0_i32_0 = arith.constant 0 : i32
    %c0_i32_1 = arith.constant 0 : i32
    return %c0_i32, %c0_i32_0 : i32, i32
  }
  func.func @transform_9(%arg0: i32) -> (i32, i32) {
    %c0_i32 = arith.constant 0 : i32
    %c0_i32_0 = arith.constant 0 : i32
    %c0_i32_1 = arith.constant 0 : i32
    return %c0_i32, %c0_i32_0 : i32, i32
  }
}

module attributes {stable_mosaic.version = 11 : i64} {
  func.func @_linear_kernel(%arg0: i32, %arg1: memref<8x64xf32, #tpu.memory_space<vmem>>, %arg2: memref<64x12xf32, #tpu.memory_space<vmem>>, %arg3: memref<1x12xf32, #tpu.memory_space<vmem>>, %arg4: memref<8x12xf32, #tpu.memory_space<vmem>>) attributes {dimension_semantics = [#tpu.dimension_semantics<arbitrary>], iteration_bounds = array<i64: 1>, scalar_prefetch = 0 : i64, scratch_operands = 0 : i64, tpu.core_type = #tpu.core_type<tc>, window_params = [{pipeline_mode = #tpu.pipeline_mode<synchronous>, transform_indices = @transform_0, window_bounds = array<i64: 8, 64>}, {pipeline_mode = #tpu.pipeline_mode<synchronous>, transform_indices = @transform_1, window_bounds = array<i64: 64, 12>}, {pipeline_mode = #tpu.pipeline_mode<synchronous>, transform_indices = @transform_2, window_bounds = array<i64: 1, 12>}, {pipeline_mode = #tpu.pipeline_mode<synchronous>, transform_indices = @transform_3, window_bounds = array<i64: 8, 12>}]} {
    %c0 = arith.constant 0 : index
    %c0_0 = arith.constant 0 : index
    %0 = vector.load %arg1[%c0, %c0_0] : memref<8x64xf32, #tpu.memory_space<vmem>>, vector<8x64xf32>
    %c0_1 = arith.constant 0 : index
    %c0_2 = arith.constant 0 : index
    %1 = vector.load %arg2[%c0_1, %c0_2] : memref<64x12xf32, #tpu.memory_space<vmem>>, vector<64x12xf32>
    %cst = arith.constant dense<0.000000e+00> : vector<8x12xf32>
    %2 = tpu.matmul %0, %1, %cst {dimension_numbers = #tpu.dot_dimension_numbers<[1], [0], [0], [1], [0, 0, 1, 1], [], []>} : vector<8x64xf32>, vector<64x12xf32>, vector<8x12xf32> -> vector<8x12xf32>
    %c0_3 = arith.constant 0 : index
    %c0_4 = arith.constant 0 : index
    %3 = vector.load %arg3[%c0_3, %c0_4] : memref<1x12xf32, #tpu.memory_space<vmem>>, vector<1x12xf32>
    %4 = vector.broadcast %3 : vector<1x12xf32> to vector<8x12xf32>
    %5 = arith.addf %2, %4 : vector<8x12xf32>
    %c0_5 = arith.constant 0 : index
    %c0_6 = arith.constant 0 : index
    %6 = vector.load %arg4[%c0_5, %c0_6] : memref<8x12xf32, #tpu.memory_space<vmem>>, vector<8x12xf32>
    tpu.vector_store %arg4[%c0_5, %c0_6], %5 {strides = array<i32>} : memref<8x12xf32, #tpu.memory_space<vmem>>, vector<8x12xf32>,
    return
  }
  func.func @transform_0(%arg0: i32) -> (i32, i32) {
    %c0_i32 = arith.constant 0 : i32
    %c0_i32_0 = arith.constant 0 : i32
    %c0_i32_1 = arith.constant 0 : i32
    return %c0_i32, %c0_i32_0 : i32, i32
  }
  func.func @transform_1(%arg0: i32) -> (i32, i32) {
    %c0_i32 = arith.constant 0 : i32
    %c0_i32_0 = arith.constant 0 : i32
    %c0_i32_1 = arith.constant 0 : i32
    return %c0_i32, %c0_i32_0 : i32, i32
  }
  func.func @transform_2(%arg0: i32) -> (i32, i32) {
    %c0_i32 = arith.constant 0 : i32
    %c0_i32_0 = arith.constant 0 : i32
    %c0_i32_1 = arith.constant 0 : i32
    return %c0_i32, %c0_i32_0 : i32, i32
  }
  func.func @transform_3(%arg0: i32) -> (i32, i32) {
    %c0_i32 = arith.constant 0 : i32
    %c0_i32_0 = arith.constant 0 : i32
    %c0_i32_1 = arith.constant 0 : i32
    return %c0_i32, %c0_i32_0 : i32, i32
  }
}

module attributes {stable_mosaic.version = 11 : i64} {
  func.func @_gat_fused_kernel(%arg0: i32, %arg1: memref<8x64xf32, #tpu.memory_space<vmem>>, %arg2: memref<64x128xf32, #tpu.memory_space<vmem>>, %arg3: memref<2x64xf32, #tpu.memory_space<vmem>>, %arg4: memref<2x8x8xf32, #tpu.memory_space<vmem>>, %arg5: memref<2xf32, #tpu.memory_space<smem>>, %arg6: memref<8x64xf32, #tpu.memory_space<vmem>>) attributes {dimension_semantics = [#tpu.dimension_semantics<arbitrary>], iteration_bounds = array<i64: 1>, scalar_prefetch = 0 : i64, scratch_operands = 0 : i64, tpu.core_type = #tpu.core_type<tc>, window_params = [{pipeline_mode = #tpu.pipeline_mode<synchronous>, transform_indices = @transform_0, window_bounds = array<i64: 8, 64>}, {pipeline_mode = #tpu.pipeline_mode<synchronous>, transform_indices = @transform_1, window_bounds = array<i64: 64, 128>}, {pipeline_mode = #tpu.pipeline_mode<synchronous>, transform_indices = @transform_2, window_bounds = array<i64: 2, 64>}, {pipeline_mode = #tpu.pipeline_mode<synchronous>, transform_indices = @transform_3, window_bounds = array<i64: 2, 8, 8>}, {transform_indices = @transform_4, window_bounds = array<i64: 2>}, {pipeline_mode = #tpu.pipeline_mode<synchronous>, transform_indices = @transform_5, window_bounds = array<i64: 8, 64>}]} {
    %c0 = arith.constant 0 : index
    %c0_0 = arith.constant 0 : index
    %0 = vector.load %arg1[%c0, %c0_0] : memref<8x64xf32, #tpu.memory_space<vmem>>, vector<8x64xf32>
    %c0_1 = arith.constant 0 : index
    %c0_2 = arith.constant 0 : index
    %1 = vector.load %arg2[%c0_1, %c0_2] : memref<64x128xf32, #tpu.memory_space<vmem>>, vector<64x128xf32>
    %cst = arith.constant dense<0.000000e+00> : vector<8x128xf32>
    %2 = tpu.matmul %0, %1, %cst {dimension_numbers = #tpu.dot_dimension_numbers<[1], [0], [0], [1], [0, 0, 1, 1], [], []>} : vector<8x64xf32>, vector<64x128xf32>, vector<8x128xf32> -> vector<8x128xf32>
    %3 = vector.extract_strided_slice %2 {offsets = [0, 0], sizes = [8, 64], strides = [1, 1]} : vector<8x128xf32> to vector<8x64xf32>
    %4 = vector.extract_strided_slice %2 {offsets = [0, 64], sizes = [8, 64], strides = [1, 1]} : vector<8x128xf32> to vector<8x64xf32>
    %c0_3 = arith.constant 0 : index
    %c0_4 = arith.constant 0 : index
    %5 = vector.load %arg3[%c0_3, %c0_4] : memref<2x64xf32, #tpu.memory_space<vmem>>, vector<2x64xf32>
    %6 = vector.extract_strided_slice %5 {offsets = [0, 0], sizes = [1, 64], strides = [1, 1]} : vector<2x64xf32> to vector<1x64xf32>
    %cst_5 = arith.constant dense<0.000000e+00> : vector<1x8xf32>
    %7 = tpu.matmul %6, %4, %cst_5 {dimension_numbers = #tpu.dot_dimension_numbers<[1], [1], [0], [0], [0, 0, 1, 0], [], []>} : vector<1x64xf32>, vector<8x64xf32>, vector<1x8xf32> -> vector<1x8xf32>
    %8 = vector.extract_strided_slice %5 {offsets = [1, 0], sizes = [1, 64], strides = [1, 1]} : vector<2x64xf32> to vector<1x64xf32>
    %cst_6 = arith.constant dense<0.000000e+00> : vector<8x1xf32>
    %9 = tpu.matmul %4, %8, %cst_6 {dimension_numbers = #tpu.dot_dimension_numbers<[1], [1], [0], [0], [0, 0, 1, 0], [], []>} : vector<8x64xf32>, vector<1x64xf32>, vector<8x1xf32> -> vector<8x1xf32>
    %c0_7 = arith.constant 0 : index
    %10 = memref.load %arg5[%c0_7] : memref<2xf32, #tpu.memory_space<smem>>
    %c0_8 = arith.constant 0 : index
    %c0_9 = arith.constant 0 : index
    %c0_10 = arith.constant 0 : index
    %11 = vector.load %arg4[%c0_8, %c0_9, %c0_10] : memref<2x8x8xf32, #tpu.memory_space<vmem>>, vector<1x8x8xf32>
    %12 = vector.shape_cast %11 : vector<1x8x8xf32> to vector<8x8xf32>
    %13 = vector.broadcast %10 : f32 to vector<8x8xf32>
    %14 = arith.mulf %13, %12 : vector<8x8xf32>
    %c1 = arith.constant 1 : index
    %15 = memref.load %arg5[%c1] : memref<2xf32, #tpu.memory_space<smem>>
    %c1_11 = arith.constant 1 : index
    %c0_12 = arith.constant 0 : index
    %c0_13 = arith.constant 0 : index
    %16 = vector.load %arg4[%c1_11, %c0_12, %c0_13] : memref<2x8x8xf32, #tpu.memory_space<vmem>>, vector<1x8x8xf32>
    %17 = vector.shape_cast %16 : vector<1x8x8xf32> to vector<8x8xf32>
    %18 = vector.broadcast %15 : f32 to vector<8x8xf32>
    %19 = arith.mulf %18, %17 : vector<8x8xf32>
    %20 = arith.addf %14, %19 : vector<8x8xf32>
    %21 = vector.broadcast %9 : vector<8x1xf32> to vector<8x8xf32>
    %22 = vector.broadcast %7 : vector<1x8xf32> to vector<8x8xf32>
    %23 = arith.addf %21, %22 : vector<8x8xf32>
    %24 = arith.addf %23, %20 : vector<8x8xf32>
    %cst_14 = arith.constant 0.000000e+00 : f32
    %25 = vector.broadcast %cst_14 : f32 to vector<8x8xf32>
    %26 = arith.cmpf ogt, %24, %25 : vector<8x8xf32>
    %cst_15 = arith.constant 0.00999999977 : f32
    %27 = vector.broadcast %cst_15 : f32 to vector<8x8xf32>
    %28 = arith.mulf %27, %24 : vector<8x8xf32>
    %29 = arith.select %26, %24, %28 : vector<8x8xi1>, vector<8x8xf32>
    %cst_16 = arith.constant dense<0xFF800000> : vector<8xf32>
    %30 = vector.multi_reduction <maximumf>, %29, %cst_16 [1] : vector<8x8xf32> to vector<8xf32>
    %31 = vector.shape_cast %30 : vector<8xf32> to vector<8x1xf32>
    %32 = vector.broadcast %31 : vector<8x1xf32> to vector<8x8xf32>
    %33 = arith.subf %29, %32 : vector<8x8xf32>
    %34 = math.exp %33 : vector<8x8xf32>
    %cst_17 = arith.constant dense<0.000000e+00> : vector<8xf32>
    %35 = vector.multi_reduction <add>, %34, %cst_17 [1] : vector<8x8xf32> to vector<8xf32>
    %36 = vector.shape_cast %35 : vector<8xf32> to vector<8x1xf32>
    %37 = tpu.reciprocal %36 {approx = true} : vector<8x1xf32> -> vector<8x1xf32>
    %38 = vector.broadcast %37 : vector<8x1xf32> to vector<8x8xf32>
    %39 = arith.mulf %34, %38 : vector<8x8xf32>
    %cst_18 = arith.constant dense<0.000000e+00> : vector<8x64xf32>
    %40 = tpu.matmul %39, %4, %cst_18 {dimension_numbers = #tpu.dot_dimension_numbers<[1], [0], [0], [1], [0, 0, 1, 1], [], []>} : vector<8x8xf32>, vector<8x64xf32>, vector<8x64xf32> -> vector<8x64xf32>
    %41 = arith.addf %3, %40 : vector<8x64xf32>
    %cst_19 = arith.constant 0.000000e+00 : f32
    %42 = vector.broadcast %cst_19 : f32 to vector<8x64xf32>
    %43 = arith.maximumf %41, %42 : vector<8x64xf32>
    %44 = arith.addf %0, %43 : vector<8x64xf32>
    %c0_20 = arith.constant 0 : index
    %c0_21 = arith.constant 0 : index
    %45 = vector.load %arg6[%c0_20, %c0_21] : memref<8x64xf32, #tpu.memory_space<vmem>>, vector<8x64xf32>
    tpu.vector_store %arg6[%c0_20, %c0_21], %44 {strides = array<i32>} : memref<8x64xf32, #tpu.memory_space<vmem>>, vector<8x64xf32>,
    return
  }
  func.func @transform_0(%arg0: i32) -> (i32, i32) {
    %c0_i32 = arith.constant 0 : i32
    %c0_i32_0 = arith.constant 0 : i32
    %c0_i32_1 = arith.constant 0 : i32
    return %c0_i32, %c0_i32_0 : i32, i32
  }
  func.func @transform_1(%arg0: i32) -> (i32, i32) {
    %c0_i32 = arith.constant 0 : i32
    %c0_i32_0 = arith.constant 0 : i32
    %c0_i32_1 = arith.constant 0 : i32
    return %c0_i32, %c0_i32_0 : i32, i32
  }
  func.func @transform_2(%arg0: i32) -> (i32, i32) {
    %c0_i32 = arith.constant 0 : i32
    %c0_i32_0 = arith.constant 0 : i32
    %c0_i32_1 = arith.constant 0 : i32
    return %c0_i32, %c0_i32_0 : i32, i32
  }
  func.func @transform_3(%arg0: i32) -> (i32, i32, i32) {
    %c0_i32 = arith.constant 0 : i32
    %c0_i32_0 = arith.constant 0 : i32
    %c0_i32_1 = arith.constant 0 : i32
    %c0_i32_2 = arith.constant 0 : i32
    return %c0_i32, %c0_i32_0, %c0_i32_1 : i32, i32, i32
  }
  func.func @transform_4(%arg0: i32) -> i32 {
    %c0_i32 = arith.constant 0 : i32
    %c0_i32_0 = arith.constant 0 : i32
    return %c0_i32 : i32
  }
  func.func @transform_5(%arg0: i32) -> (i32, i32) {
    %c0_i32 = arith.constant 0 : i32
    %c0_i32_0 = arith.constant 0 : i32
    %c0_i32_1 = arith.constant 0 : i32
    return %c0_i32, %c0_i32_0 : i32, i32
  }
}

</mosaic_0001>

<bundles_post_ra>
// kernel: squeeze.4
= control target key start
LH: loop header
LB: loop body
LE: loop exit
PB: predicated region body
PF: predicated region fallthrough
CT: control target
= control target key end

     0   :  { %vm7_vm0 = vcmask 523264   ;;  %s39_s0 = inlined_call_operand.vmem [shape: f32[128], index: 0, kind: input, shape index: {}]   ;;  %s40_s1 = inlined_call_operand.vmem [shape: f32[2,64], index: 1, kind: output, shape index: {}]  }
   0x1   :  { %v4_v0 = vld [vmem:[%s39_s0] sm:$0x1]  ;;  %s22_s0 = smov 64  }
   0x2   :  { %5 = vst [vmem:[#allocation1] sm:$0x1] %v4_v0 }
   0x9   :  { %v9_v1 = vld [vmem:[#allocation1] sm:$0x1]  }
   0xa   :  { %v6_v2 = vld [vmem:[#allocation1] sm:$0x1]   ;;  %10 = vrot.lane.b32.xlu0 %v9_v1, %s22_s0 }
   0xb   :  { %8 = vst.msk [vmem:[#allocation0] sm:$0x1] %vm7_vm0, %v6_v2  }
  0x7c   :  { %v11_v3 = vpop.permute.xlu0 %10  }
  0x7d   :  { %14 = vst.msk [vmem:[#allocation0 + $0x1] sm:$0x1] %vm7_vm0, %v11_v3  }
  0x84   :  { %v17_v4 = vld [vmem:[#allocation0] sm:$0x3] }
  0x85   :  { %20 = vst [vmem:[%s40_s1] sm:$0x3] %v17_v4 }

// kernel: scout_forward.7
= control target key start
LH: loop header
LB: loop body
LE: loop exit
PB: predicated region body
PF: predicated region fallthrough
CT: control target
= control target key end

     0   :  { %s153_s0 = inlined_call_operand.vmem [shape: f32[8,64], index: 0, kind: input, shape index: {}]   ;;  %s154_s1 = inlined_call_operand.vmem [shape: f32[64,12], index: 1, kind: input, shape index: {}]   ;;  %s155_s2 = inlined_call_operand.vmem [shape: f32[1,12], index: 2, kind: input, shape index: {}]   ;;  %s156_s3 = inlined_call_operand.hbm [shape: f32[8,12], index: 3, kind: output, shape index: {}]  }
   0x1   :  { %v23_v0 = vld [vmem:[%s154_s1 + $0x38] sm:$0xff]  ;;  %v22_v1 = vld [vmem:[%s154_s1 + $0x30] sm:$0xff]  ;;  %v21_v2 = vld [vmem:[%s154_s1 + $0x28] sm:$0xff] }
   0x2   :  { %40 = vmatpush.msra.mxu0 %v23_v0 }
   0x4   :  { %41 = vmatpush.msra.mxu0 %v22_v1 }
   0x5   :  { %8 = vsyncpa [#allocation3], 0  ;;  %v20_v3 = vld [vmem:[%s154_s1 + $0x20] sm:$0xff]  ;;  %v19_v4 = vld [vmem:[%s154_s1 + $0x18] sm:$0xff]  ;;  %vm28_vm0 = vcmask 523264   ;;  %s99_s5 = smov [#allocation2]  }
   0x6   :  { %42 = vmatpush.msra.mxu0 %v21_v2  ;;  %v18_v5 = vld [vmem:[%s154_s1 + $0x10] sm:$0xff]  ;;  %v17_v6 = vld [vmem:[%s154_s1 + $0x8] sm:$0xff]  ;;  %v16_v7 = vld [vmem:[%s154_s1] sm:$0xff]  ;;  %s59_s6 = sshll.u32 %s99_s5, 4  ;;  %s61_s9 = sshll.u32 %s156_s3, 4  ;;  %vm52_vm1 = vcmask 97280   ;;  %s60_s6 = int_to_ptr.vmem [resolvable:$true] %s59_s6  ;;  %s62_s9 = int_to_ptr.hbm [resolvable:$true] %s61_s9 }
   0x7   :  { %v15_v8 = vld [vmem:[%s153_s0] sm:$0xff] }
   0x8   :  { %43 = vmatpush.msra.mxu0 %v20_v3  ;;  %v72_v9 = vld [vmem:[%s155_s2] ss:$0 sm:$0xff] }
   0xa   :  { %44 = vmatpush.msra.mxu0 %v19_v4 }
   0xc   :  { %45 = vmatpush.msra.mxu0 %v18_v5 }
   0xe   :  { %46 = vmatpush.msra.mxu0 %v17_v6 }
  0x10   :  { %47 = vmatpush.msra.mxu0 %v16_v7 }
  0x11   :  { %70 = vmatmul.msk.f32.vlgmr.msra.gmra.mxu0 %vm28_vm0, %v15_v8 }
  0x8e   :  { %v49_v10 = vpop.f32.mrf.mxu0 }
  0x8f   :  { %v50_v11 = vadd.f32 %v72_v9, %v49_v10 }
  0x91   :  { %53 = vst.msk [vmem:[#allocation2] sm:$0xff] %vm52_vm1, %v50_v11 }
  0x92   :  { %64 = dma.vmem_to_hbm [thread:$0]  %s60_s6, 128, %s62_s9, [#allocation3]  }
  0x93   :  { %97 = dma.done.wait [#allocation3], 128  }
  0x94   :  { %98 = vsyncadd [#allocation3], 4294967168 }
  0x95   :  { %69 = vsyncpa [#allocation3], 1 }

// kernel: scout_forward.5
= control target key start
LH: loop header
LB: loop body
LE: loop exit
PB: predicated region body
PF: predicated region fallthrough
CT: control target
= control target key end

     0   :  { %10 = vsyncpa [#allocation3], 0  ;;  %s195_s21 = smov [#allocation2]   ;;  %s274_s0 = inlined_call_operand.vmem [shape: f32[8,64], index: 0, kind: input, shape index: {}]   ;;  %s275_s1 = inlined_call_operand.vmem [shape: f32[64,128], index: 1, kind: input, shape index: {}]   ;;  %s276_s2 = inlined_call_operand.vmem [shape: f32[2,64], index: 2, kind: input, shape index: {}]   ;;  %s277_s3 = inlined_call_operand.vmem [shape: f32[2,8,8], index: 3, kind: input, shape index: {}]   ;;  %s278_s4 = inlined_call_operand.vmem [shape: f32[2], index: 4, kind: input, shape index: {}]   ;;  %s279_s5 = inlined_call_operand.vmem [shape: f32[8,64], index: 5, kind: output, shape index: {}]  }
   0x1   :  { %s24_s20 = sshll.u32 %s278_s4, 4  ;;  %s25_s20 = int_to_ptr.vmem [resolvable:$true] %s24_s20 }
   0x2   :  { %27 = dma.vmem_to_smem %s25_s20, 16, %s195_s21, [#allocation3]  }
   0x3   :  { %193 = dma.done.wait [#allocation3], 16  }
   0x4   :  { %194 = vsyncadd [#allocation3], 4294967280 }
   0x5   :  { %32 = sfence }
   0x6   :  { %v41_v0 = vld [vmem:[%s275_s1 + $0x38] sm:$0xff]  ;;  %v40_v1 = vld [vmem:[%s275_s1 + $0x30] sm:$0xff]  ;;  %v39_v2 = vld [vmem:[%s275_s1 + $0x28] sm:$0xff]  ;;  %vm42_vm0 = vcmask 523264   ;;  %s196_s14 = smov 64   ;;  %vm124_vm2 = vcmask 64512  }
   0x7   :  { %54 = vmatpush.msra.mxu0 %v41_v0  ;;  %v38_v3 = vld [vmem:[%s275_s1 + $0x20] sm:$0xff]  ;;  %v37_v4 = vld [vmem:[%s275_s1 + $0x18] sm:$0xff]  ;;  %v36_v5 = vld [vmem:[%s275_s1 + $0x10] sm:$0xff] }
   0x8   :  { %v35_v6 = vld [vmem:[%s275_s1 + $0x8] sm:$0xff]  ;;  %v34_v7 = vld [vmem:[%s275_s1] sm:$0xff]  ;;  %s172_s1 = sld [smem:[#allocation2 + $0x1]] }
   0x9   :  { %55 = vmatpush.msra.mxu0 %v40_v1  ;;  %v33_v8 = vld [vmem:[%s274_s0] sm:$0xff]  ;;  %s108_s0 = sld [smem:[#allocation2]]  ;;  %v173_v19 = vld [vmem:[%s277_s3 + $0x8] sm:$0xff] }
   0xa   :  { %v66_v10 = vld [vmem:[%s276_s2] sm:$0x3] }
   0xb   :  { %56 = vmatpush.msra.mxu0 %v39_v2  ;;  %v95_v11 = vperm.slane %v66_v10, 1  ;;  %v109_v17 = vld [vmem:[%s277_s3] sm:$0xff] }
   0xd   :  { %57 = vmatpush.msra.mxu0 %v38_v3 }
   0xe   :  { %v115_v20 = vstv %s172_s1 }
   0xf   :  { %58 = vmatpush.msra.mxu0 %v37_v4  ;;  %v110_v18 = vstv %s108_s0  ;;  %v116_v23 = vmul.f32 %v173_v19, %v115_v20 }
  0x10   :  { %v111_v22 = vmul.f32 %v110_v18, %v109_v17 }
  0x11   :  { %59 = vmatpush.msra.mxu0 %v36_v5 }
  0x12   :  { %v117_v25 = vadd.f32 %v116_v23, %v111_v22 }
  0x13   :  { %60 = vmatpush.msra.mxu0 %v35_v6 }
  0x15   :  { %61 = vmatpush.msra.mxu0 %v34_v7 }
  0x16   :  { %169 = vmatmul.msk.f32.vlgmr.msra.gmra.mxu0 %vm42_vm0, %v33_v8 }
  0x93   :  { %v63_v9 = vpop.f32.mrf.mxu0 }
  0x94   :  { %68 = vrot.lane.b32.xlu0 %v63_v9, %s196_s14 }
  0x9c   :  { %97 = vrot.lane.b32.xlu0 %v95_v11, %s196_s14 }
 0x106   :  { %v69_v12 = vpop.permute.xlu0 %68 }
 0x107   :  { %170 = vmatpush.xpose.msk.msra.mxu1 %vm42_vm0, %v69_v12  ;;  %155 = vmatpush.msra.mxu2 %v69_v12 }
 0x10a   :  { %171 = vmatmul.msk.f32.vlgmr.msra.gmra.mxu1 %vm42_vm0, %v66_v10 }
 0x10e   :  { %v98_v13 = vpop.permute.xlu0 %97 }
 0x10f   :  { %v100_v14 = vmul.f32 %v98_v13, %v63_v9 }
 0x111   :  { %102 = vrot.lane.b32.xlu1 %v100_v14, %s196_s14 }
 0x183   :  { %v103_v15 = vpop.permute.xlu1 %102 }
 0x184   :  { %v105_v16 = vsel %vm42_vm0, %v103_v15, 0.0 }
 0x185   :  { %106 = vadd.xlane.f32.xlu1 %v105_v16 }
 0x187   :  { %v92_v21 = vpop.f32.mrf.mxu1 }
 0x188   :  { %v118_v24 = vperm.slane %v92_v21, 0 }
 0x1f8   :  { %v107_v26 = vpop.xlane.xlu1 %106 }
 0x1f9   :  { %v119_v27 = vadd.f32 %v118_v24, %v107_v26 }
 0x1fb   :  { %v120_v28 = vadd.f32 %v119_v27, %v117_v25 }
 0x1fd   :  { %vm121_vm1 = vcmp.gt.f32.partialorder %v120_v28, 0.0  ;;  %v122_v29 = vmul.f32 0.01, %v120_v28 }
 0x1ff   :  { %v123_v30 = vsel %vm121_vm1, %v120_v28, %v122_v29 }
 0x200   :  { %v125_v31 = vsel %vm124_vm2, %v123_v30, -inf }
 0x201   :  { %126 = vmax.xlane.f32.xlu2 %v125_v31 }
 0x274   :  { %v127_v32 = vpop.xlane.xlu2 %126 }
 0x275   :  { %v128_v33 = vsub.f32 %v123_v30, %v127_v32 }
 0x277   :  { %v129_v34 = vmul.f32 1.442695, %v128_v33 }
 0x279   :  { %177 = vpow2.f32 %v129_v34 }
 0x27f   :  { %v178_v35 = vpop.eup %177 }
 0x280   :  { %v131_v36 = vsel %vm124_vm2, %v178_v35, 0.0 }
 0x281   :  { %132 = vadd.xlane.f32.xlu2 %v131_v36 }
 0x2f4   :  { %v133_v37 = vpop.xlane.xlu2 %132 }
 0x2f5   :  { %179 = vrcp.f32 %v133_v37 }
 0x2fb   :  { %v180_v38 = vpop.eup %179 }
 0x2fc   :  { %v135_v39 = vmul.f32 %v180_v38, %v178_v35 }
 0x2fe   :  { %174 = vmatmul.msk.f32.vlgmr.msra.gmra.mxu2 %vm124_vm2, %v135_v39 }
 0x381   :  { %v157_v40 = vpop.f32.mrf.mxu2 }
 0x382   :  { %v160_v41 = vadd.f32 %v157_v40, %v63_v9 }
 0x384   :  { %v161_v42 = vmax.f32 %v160_v41, 0.0 }
 0x386   :  { %v162_v43 = vadd.f32 %v161_v42, %v33_v8 }
 0x388   :  { %163 = vst.msk [vmem:[%s279_s5] sm:$0xff] %vm42_vm0, %v162_v43 }
 0x389   :  { %168 = vsyncpa [#allocation3], 1 }

// kernel: scout_forward.4
= control target key start
LH: loop header
LB: loop body
LE: loop exit
PB: predicated region body
PF: predicated region fallthrough
CT: control target
= control target key end

     0   :  { %vm295_vm0 = vcmask 1040384   ;;  %vm102_vm1 = vcmask 72704   ;;  %vm693_vm2 = vcmask 195584   ;;  %vm661_vm3 = vcmask 64512   ;;  %s1338_s1 = inlined_call_operand.vmem [shape: f32[9,8], index: 1, kind: input, shape index: {}]   ;;  %s1339_s0 = inlined_call_operand.vmem [shape: f32[512,9], index: 0, kind: input, shape index: {}]   ;;  %s1340_s2 = inlined_call_operand.vmem [shape: f32[1,8], index: 2, kind: input, shape index: {}]   ;;  %s1341_s3 = inlined_call_operand.vmem [shape: f32[8,512], index: 3, kind: input, shape index: {}]   ;;  %s1342_s7 = inlined_call_operand.vmem [shape: f32[24,32], index: 7, kind: input, shape index: {}]   ;;  %s1343_s6 = inlined_call_operand.vmem [shape: f32[8,24], index: 6, kind: input, shape index: {}]   ;;  %s1344_s8 = inlined_call_operand.vmem [shape: f32[1,32], index: 8, kind: input, shape index: {}]   ;;  %s1345_s5 = inlined_call_operand.vmem [shape: f32[1,32], index: 5, kind: input, shape index: {}]   ;;  %s1346_s4 = inlined_call_operand.vmem [shape: f32[8,32], index: 4, kind: input, shape index: {}]   ;;  %s1347_s9 = inlined_call_operand.vmem [shape: f32[8,64], index: 9, kind: output, shape index: {}]  }
   0x1   :  { %v97_v0 = vld [vmem:[%s1338_s1 + $0x8] sm:$0x1]  ;;  %v96_v1 = vld [vmem:[%s1338_s1] sm:$0xff]  ;;  %v79_v5 = vld [vmem:[%s1339_s0 + $0x178] sm:$0xff]  ;;  %vm717_vm4 = vcmask 261120   ;;  %vm723_vm5 = vcmask 523520  }
   0x2   :  { %729 = vmatpush.msk.msra.mxu0 %vm295_vm0, %v97_v0  ;;  %797 = vmatpush.msk.msra.mxu2 %vm295_vm0, %v97_v0  ;;  %v32_v2 = vld [vmem:[%s1339_s0] sm:$0xff]  ;;  %v61_v3 = vld [vmem:[%s1339_s0 + $0xe8] sm:$0xff]  ;;  %v62_v7 = vld [vmem:[%s1339_s0 + $0xf0] sm:$0xff] }
   0x3   :  { %796 = vmatpush.msk.msra.mxu1 %vm295_vm0, %v97_v0  ;;  %798 = vmatpush.msk.msra.mxu3 %vm295_vm0, %v97_v0  ;;  %v52_v4 = vld [vmem:[%s1339_s0 + $0xa0] sm:$0xff]  ;;  %v33_v6 = vld [vmem:[%s1339_s0 + $0x8] sm:$0xff]  ;;  %v34_v10 = vld [vmem:[%s1339_s0 + $0x10] sm:$0xff] }
   0x4   :  { %314 = vmatpush.msra.mxu0 %v96_v1  ;;  %800 = vmatpush.msra.mxu2 %v96_v1  ;;  %v53_v8 = vld [vmem:[%s1339_s0 + $0xa8] sm:$0xff]  ;;  %v80_v9 = vld [vmem:[%s1339_s0 + $0x180] sm:$0xff]  ;;  %v63_v11 = vld [vmem:[%s1339_s0 + $0xf8] sm:$0xff] }
   0x5   :  { %730 = vmatmul.msk.f32.vlgmr.msra.gmra.mxu0 %vm102_vm1, %v32_v2  ;;  %759 = vmatmul.msk.f32.vlgmr.msra.gmra.mxu2 %vm102_vm1, %v61_v3  ;;  %v54_v12 = vld [vmem:[%s1339_s0 + $0xb0] sm:$0xff]  ;;  %v81_v13 = vld [vmem:[%s1339_s0 + $0x188] sm:$0xff]  ;;  %v35_v14 = vld [vmem:[%s1339_s0 + $0x18] sm:$0xff] }
   0x6   :  { %799 = vmatpush.msra.mxu1 %v96_v1  ;;  %801 = vmatpush.msra.mxu3 %v96_v1  ;;  %v64_v15 = vld [vmem:[%s1339_s0 + $0x100] sm:$0xff]  ;;  %v55_v16 = vld [vmem:[%s1339_s0 + $0xb8] sm:$0xff]  ;;  %v82_v17 = vld [vmem:[%s1339_s0 + $0x190] sm:$0xff] }
   0x7   :  { %750 = vmatmul.msk.f32.vlgmr.msra.gmra.mxu1 %vm102_vm1, %v52_v4  ;;  %777 = vmatmul.msk.f32.vlgmr.msra.gmra.mxu3 %vm102_vm1, %v79_v5  ;;  %v36_v18 = vld [vmem:[%s1339_s0 + $0x20] sm:$0xff]  ;;  %v65_v19 = vld [vmem:[%s1339_s0 + $0x108] sm:$0xff]  ;;  %v83_v21 = vld [vmem:[%s1339_s0 + $0x198] sm:$0xff] }
   0x8   :  { %v56_v20 = vld [vmem:[%s1339_s0 + $0xc0] sm:$0xff]  ;;  %v37_v22 = vld [vmem:[%s1339_s0 + $0x28] sm:$0xff]  ;;  %v66_v23 = vld [vmem:[%s1339_s0 + $0x110] sm:$0xff] }
   0x9   :  { %v57_v24 = vld [vmem:[%s1339_s0 + $0xc8] sm:$0xff]  ;;  %v84_v25 = vld [vmem:[%s1339_s0 + $0x1a0] sm:$0xff]  ;;  %v38_v26 = vld [vmem:[%s1339_s0 + $0x30] sm:$0xff] }
   0xa   :  { %v67_v27 = vld [vmem:[%s1339_s0 + $0x118] sm:$0xff]  ;;  %v58_v28 = vld [vmem:[%s1339_s0 + $0xd0] sm:$0xff]  ;;  %v85_v29 = vld [vmem:[%s1339_s0 + $0x1a8] sm:$0xff] }
   0xb   :  { %v39_v30 = vld [vmem:[%s1339_s0 + $0x38] sm:$0xff]  ;;  %v68_v31 = vld [vmem:[%s1339_s0 + $0x120] sm:$0xff]  ;;  %v86_v33 = vld [vmem:[%s1339_s0 + $0x1b0] sm:$0xff] }
   0xc   :  { %v59_v32 = vld [vmem:[%s1339_s0 + $0xd8] sm:$0xff]  ;;  %v40_v34 = vld [vmem:[%s1339_s0 + $0x40] sm:$0xff]  ;;  %v69_v35 = vld [vmem:[%s1339_s0 + $0x128] sm:$0xff] }
   0xd   :  { %731 = vmatmul.msk.f32.gmra.mxu0 %vm102_vm1, %v33_v6  ;;  %760 = vmatmul.msk.f32.gmra.mxu2 %vm102_vm1, %v62_v7  ;;  %v60_v36 = vld [vmem:[%s1339_s0 + $0xe0] sm:$0xff]  ;;  %v87_v37 = vld [vmem:[%s1339_s0 + $0x1b8] sm:$0xff]  ;;  %v41_v38 = vld [vmem:[%s1339_s0 + $0x48] sm:$0xff] }
   0xe   :  { %v70_v39 = vld [vmem:[%s1339_s0 + $0x130] sm:$0xff]  ;;  %v88_v40 = vld [vmem:[%s1339_s0 + $0x1c0] sm:$0xff]  ;;  %v71_v42 = vld [vmem:[%s1339_s0 + $0x138] sm:$0xff] }
   0xf   :  { %751 = vmatmul.msk.f32.gmra.mxu1 %vm102_vm1, %v53_v8  ;;  %778 = vmatmul.msk.f32.gmra.mxu3 %vm102_vm1, %v80_v9  ;;  %v42_v41 = vld [vmem:[%s1339_s0 + $0x50] sm:$0xff]  ;;  %v89_v43 = vld [vmem:[%s1339_s0 + $0x1c8] sm:$0xff]  ;;  %v43_v44 = vld [vmem:[%s1339_s0 + $0x58] sm:$0xff] }
  0x10   :  { %v72_v45 = vld [vmem:[%s1339_s0 + $0x140] sm:$0xff]  ;;  %v90_v46 = vld [vmem:[%s1339_s0 + $0x1d0] sm:$0xff]  ;;  %v73_v48 = vld [vmem:[%s1339_s0 + $0x148] sm:$0xff] }
  0x11   :  { %v44_v47 = vld [vmem:[%s1339_s0 + $0x60] sm:$0xff]  ;;  %v91_v49 = vld [vmem:[%s1339_s0 + $0x1d8] sm:$0xff]  ;;  %v45_v50 = vld [vmem:[%s1339_s0 + $0x68] sm:$0xff] }
  0x12   :  { %v74_v51 = vld [vmem:[%s1339_s0 + $0x150] sm:$0xff]  ;;  %v92_v52 = vld [vmem:[%s1339_s0 + $0x1e0] sm:$0xff]  ;;  %v75_v54 = vld [vmem:[%s1339_s0 + $0x158] sm:$0xff] }
  0x13   :  { %v46_v53 = vld [vmem:[%s1339_s0 + $0x70] sm:$0xff]  ;;  %v93_v55 = vld [vmem:[%s1339_s0 + $0x1e8] sm:$0xff]  ;;  %v47_v56 = vld [vmem:[%s1339_s0 + $0x78] sm:$0xff] }
  0x14   :  { %v76_v57 = vld [vmem:[%s1339_s0 + $0x160] sm:$0xff]  ;;  %v94_v58 = vld [vmem:[%s1339_s0 + $0x1f0] sm:$0xff]  ;;  %v77_v60 = vld [vmem:[%s1339_s0 + $0x168] sm:$0xff] }
  0x15   :  { %732 = vmatmul.msk.f32.gmra.mxu0 %vm102_vm1, %v34_v10  ;;  %761 = vmatmul.msk.f32.gmra.mxu2 %vm102_vm1, %v63_v11  ;;  %v48_v61 = vld [vmem:[%s1339_s0 + $0x80] sm:$0xff]  ;;  %v95_v63 = vld [vmem:[%s1339_s0 + $0x1f8] sm:$0xff]  ;;  %v78_v3 = vld [vmem:[%s1339_s0 + $0x170] sm:$0xff] }
  0x16   :  { %v1110_v1 = vld [vmem:[%s1340_s2] ss:$0 sm:$0xff]  ;;  %v49_v5 = vld [vmem:[%s1339_s0 + $0x88] sm:$0xff] }
  0x17   :  { %752 = vmatmul.msk.f32.gmra.mxu1 %vm102_vm1, %v54_v12  ;;  %779 = vmatmul.msk.f32.gmra.mxu3 %vm102_vm1, %v81_v13  ;;  %v50_v12 = vld [vmem:[%s1339_s0 + $0x90] sm:$0xff] }
  0x1d   :  { %733 = vmatmul.msk.f32.gmra.mxu0 %vm102_vm1, %v35_v14  ;;  %762 = vmatmul.msk.f32.gmra.mxu2 %vm102_vm1, %v64_v15 }
  0x1f   :  { %753 = vmatmul.msk.f32.gmra.mxu1 %vm102_vm1, %v55_v16  ;;  %780 = vmatmul.msk.f32.gmra.mxu3 %vm102_vm1, %v82_v17 }
  0x25   :  { %734 = vmatmul.msk.f32.gmra.mxu0 %vm102_vm1, %v36_v18  ;;  %763 = vmatmul.msk.f32.gmra.mxu2 %vm102_vm1, %v65_v19  ;;  %v51_v19 = vld [vmem:[%s1339_s0 + $0x98] sm:$0xff] }
  0x27   :  { %754 = vmatmul.msk.f32.gmra.mxu1 %vm102_vm1, %v56_v20  ;;  %781 = vmatmul.msk.f32.gmra.mxu3 %vm102_vm1, %v83_v21 }
  0x2d   :  { %735 = vmatmul.msk.f32.gmra.mxu0 %vm102_vm1, %v37_v22  ;;  %764 = vmatmul.msk.f32.gmra.mxu2 %vm102_vm1, %v66_v23 }
  0x2f   :  { %755 = vmatmul.msk.f32.gmra.mxu1 %vm102_vm1, %v57_v24  ;;  %782 = vmatmul.msk.f32.gmra.mxu3 %vm102_vm1, %v84_v25 }
  0x35   :  { %736 = vmatmul.msk.f32.gmra.mxu0 %vm102_vm1, %v38_v26  ;;  %765 = vmatmul.msk.f32.gmra.mxu2 %vm102_vm1, %v67_v27 }
  0x37   :  { %756 = vmatmul.msk.f32.gmra.mxu1 %vm102_vm1, %v58_v28  ;;  %783 = vmatmul.msk.f32.gmra.mxu3 %vm102_vm1, %v85_v29 }
  0x3d   :  { %737 = vmatmul.msk.f32.gmra.mxu0 %vm102_vm1, %v39_v30  ;;  %766 = vmatmul.msk.f32.gmra.mxu2 %vm102_vm1, %v68_v31 }
  0x3f   :  { %757 = vmatmul.msk.f32.gmra.mxu1 %vm102_vm1, %v59_v32  ;;  %784 = vmatmul.msk.f32.gmra.mxu3 %vm102_vm1, %v86_v33 }
  0x45   :  { %738 = vmatmul.msk.f32.gmra.mxu0 %vm102_vm1, %v40_v34  ;;  %767 = vmatmul.msk.f32.gmra.mxu2 %vm102_vm1, %v69_v35 }
  0x47   :  { %758 = vmatmul.msk.f32.gmra.mxu1 %vm102_vm1, %v60_v36  ;;  %785 = vmatmul.msk.f32.gmra.mxu3 %vm102_vm1, %v87_v37 }
  0x4d   :  { %739 = vmatmul.msk.f32.gmra.mxu0 %vm102_vm1, %v41_v38  ;;  %768 = vmatmul.msk.f32.gmra.mxu2 %vm102_vm1, %v70_v39 }
  0x4f   :  { %786 = vmatmul.msk.f32.gmra.mxu3 %vm102_vm1, %v88_v40 }
  0x55   :  { %740 = vmatmul.msk.f32.gmra.mxu0 %vm102_vm1, %v42_v41  ;;  %769 = vmatmul.msk.f32.gmra.mxu2 %vm102_vm1, %v71_v42 }
  0x57   :  { %787 = vmatmul.msk.f32.gmra.mxu3 %vm102_vm1, %v89_v43 }
  0x5d   :  { %741 = vmatmul.msk.f32.gmra.mxu0 %vm102_vm1, %v43_v44  ;;  %770 = vmatmul.msk.f32.gmra.mxu2 %vm102_vm1, %v72_v45 }
  0x5f   :  { %788 = vmatmul.msk.f32.gmra.mxu3 %vm102_vm1, %v90_v46 }
  0x65   :  { %742 = vmatmul.msk.f32.gmra.mxu0 %vm102_vm1, %v44_v47  ;;  %771 = vmatmul.msk.f32.gmra.mxu2 %vm102_vm1, %v73_v48 }
  0x67   :  { %789 = vmatmul.msk.f32.gmra.mxu3 %vm102_vm1, %v91_v49 }
  0x6d   :  { %743 = vmatmul.msk.f32.gmra.mxu0 %vm102_vm1, %v45_v50  ;;  %772 = vmatmul.msk.f32.gmra.mxu2 %vm102_vm1, %v74_v51 }
  0x6f   :  { %790 = vmatmul.msk.f32.gmra.mxu3 %vm102_vm1, %v92_v52 }
  0x75   :  { %744 = vmatmul.msk.f32.gmra.mxu0 %vm102_vm1, %v46_v53  ;;  %773 = vmatmul.msk.f32.gmra.mxu2 %vm102_vm1, %v75_v54 }
  0x77   :  { %791 = vmatmul.msk.f32.gmra.mxu3 %vm102_vm1, %v93_v55 }
  0x7d   :  { %745 = vmatmul.msk.f32.gmra.mxu0 %vm102_vm1, %v47_v56  ;;  %774 = vmatmul.msk.f32.gmra.mxu2 %vm102_vm1, %v76_v57 }
  0x7f   :  { %792 = vmatmul.msk.f32.gmra.mxu3 %vm102_vm1, %v94_v58 }
  0x82   :  { %v1091_v59 = vpop.f32.mrf.mxu0 }
  0x84   :  { %v1099_v62 = vpop.f32.mrf.mxu1 }
  0x85   :  { %775 = vmatmul.msk.f32.gmra.mxu2 %vm102_vm1, %v77_v60  ;;  %746 = vmatmul.msk.f32.gmra.mxu0 %vm102_vm1, %v48_v61 }
  0x87   :  { %793 = vmatmul.msk.f32.gmra.mxu3 %vm102_vm1, %v95_v63 }
  0x88   :  { %v403_v0 = vpop.f32.mrf.mxu2 }
  0x89   :  { %v404_v20 = vadd.f32 %v1110_v1, %v403_v0 }
  0x8a   :  { %v1112_v2 = vpop.f32.mrf.mxu0  ;;  %v457_v4 = vpop.f32.mrf.mxu3 }
  0x8b   :  { %v458_v6 = vadd.f32 %v1110_v1, %v457_v4  ;;  %v537_v24 = vmax.f32 %v404_v20, 0.0 }
  0x8c   :  { %v1121_v7 = vpop.f32.mrf.mxu1 }
  0x8d   :  { %776 = vmatmul.msk.f32.gmra.mxu2 %vm102_vm1, %v78_v3  ;;  %v555_v8 = vmax.f32 %v458_v6, 0.0  ;;  %747 = vmatmul.msk.f32.gmra.mxu0 %vm102_vm1, %v49_v5  ;;  %v380_v61 = vadd.f32 %v1110_v1, %v1121_v7  ;;  %v377_v3 = vadd.f32 %v1110_v1, %v1099_v62 }
  0x8f   :  { %616 = vmatpush.msrb.mxu3 %v555_v8  ;;  %v529_v8 = vmax.f32 %v380_v61, 0.0 }
  0x90   :  { %v406_v9 = vpop.f32.mrf.mxu2 }
  0x91   :  { %v407_v15 = vadd.f32 %v1110_v1, %v406_v9  ;;  %v528_v9 = vmax.f32 %v377_v3, 0.0 }
  0x92   :  { %v1125_v10 = vpop.f32.mrf.mxu0  ;;  %v1127_v11 = vpop.f32.mrf.mxu3 }
  0x93   :  { %v538_v23 = vmax.f32 %v407_v15, 0.0 }
  0x94   :  { %v382_v13 = vpop.f32.mrf.mxu1 }
  0x95   :  { %748 = vmatmul.msk.f32.gmra.mxu0 %vm102_vm1, %v50_v12  ;;  %v383_v58 = vadd.f32 %v1110_v1, %v382_v13 }
  0x97   :  { %v530_v4 = vmax.f32 %v383_v58, 0.0 }
  0x98   :  { %v409_v14 = vpop.f32.mrf.mxu2 }
  0x99   :  { %v410_v16 = vadd.f32 %v1110_v1, %v409_v14 }
  0x9a   :  { %v1135_v17 = vpop.f32.mrf.mxu0  ;;  %v1137_v18 = vpop.f32.mrf.mxu3 }
  0x9b   :  { %v539_v21 = vmax.f32 %v410_v16, 0.0 }
  0x9c   :  { %v385_v22 = vpop.f32.mrf.mxu1 }
  0x9d   :  { %596 = vmatpush.msrb.mxu2 %v539_v21  ;;  %749 = vmatmul.msk.f32.gmra.mxu0 %vm102_vm1, %v51_v19  ;;  %v386_v56 = vadd.f32 %v1110_v1, %v385_v22 }
  0x9f   :  { %597 = vmatpush.msrb.mxu2 %v538_v23  ;;  %v531_v63 = vmax.f32 %v386_v56, 0.0 }
  0xa0   :  { %v1144_v25 = vpop.f32.mrf.mxu2 }
  0xa1   :  { %598 = vmatpush.msrb.mxu2 %v537_v24 }
  0xa2   :  { %v1146_v26 = vpop.f32.mrf.mxu0  ;;  %v1148_v27 = vpop.f32.mrf.mxu3 }
  0xa4   :  { %v388_v28 = vpop.f32.mrf.mxu1 }
  0xa5   :  { %v389_v52 = vadd.f32 %v1110_v1, %v388_v28 }
  0xa7   :  { %v532_v60 = vmax.f32 %v389_v52, 0.0 }
  0xa8   :  { %v1150_v29 = vpop.f32.mrf.mxu2 }
  0xaa   :  { %v1152_v30 = vpop.f32.mrf.mxu0  ;;  %v1154_v31 = vpop.f32.mrf.mxu3 }
  0xac   :  { %v391_v32 = vpop.f32.mrf.mxu1 }
  0xad   :  { %v392_v48 = vadd.f32 %v1110_v1, %v391_v32 }
  0xaf   :  { %v533_v57 = vmax.f32 %v392_v48, 0.0 }
  0xb0   :  { %v1156_v33 = vpop.f32.mrf.mxu2 }
  0xb2   :  { %v1158_v34 = vpop.f32.mrf.mxu0  ;;  %v1160_v35 = vpop.f32.mrf.mxu3 }
  0xb4   :  { %v394_v36 = vpop.f32.mrf.mxu1 }
  0xb5   :  { %v395_v46 = vadd.f32 %v1110_v1, %v394_v36 }
  0xb7   :  { %v534_v53 = vmax.f32 %v395_v46, 0.0 }
  0xb8   :  { %v1162_v37 = vpop.f32.mrf.mxu2 }
  0xba   :  { %v1164_v38 = vpop.f32.mrf.mxu0  ;;  %v1166_v39 = vpop.f32.mrf.mxu3 }
  0xbb   :  { %v338_v3 = vadd.f32 %v1110_v1, %v1164_v38 }
  0xbc   :  { %v397_v40 = vpop.f32.mrf.mxu1 }
  0xbd   :  { %v398_v44 = vadd.f32 %v1110_v1, %v397_v40 }
  0xbf   :  { %v535_v49 = vmax.f32 %v398_v44, 0.0 }
  0xc0   :  { %v1168_v41 = vpop.f32.mrf.mxu2 }
  0xc2   :  { %v1170_v42 = vpop.f32.mrf.mxu0  ;;  %v1172_v43 = vpop.f32.mrf.mxu3 }
  0xc4   :  { %v400_v45 = vpop.f32.mrf.mxu1 }
  0xc5   :  { %v401_v47 = vadd.f32 %v1110_v1, %v400_v45 }
  0xc7   :  { %v536_v50 = vmax.f32 %v401_v47, 0.0 }
  0xc8   :  { %v1178_v51 = vpop.f32.mrf.mxu2 }
  0xc9   :  { %599 = vmatpush.msrb.mxu2 %v536_v50 }
  0xca   :  { %v343_v54 = vpop.f32.mrf.mxu0  ;;  %v1181_v55 = vpop.f32.mrf.mxu3 }
  0xcb   :  { %600 = vmatpush.msrb.mxu2 %v535_v49 }
  0xcd   :  { %601 = vmatpush.msrb.mxu2 %v534_v53 }
  0xcf   :  { %602 = vmatpush.msrb.mxu2 %v533_v57  ;;  %v344_v57 = vadd.f32 %v1110_v1, %v343_v54  ;;  %v332_v54 = vadd.f32 %v1110_v1, %v1152_v30  ;;  %v323_v30 = vadd.f32 %v1110_v1, %v1125_v10  ;;  %v317_v10 = vadd.f32 %v1110_v1, %v1091_v59 }
  0xd0   :  { %v1187_v0 = vpop.f32.mrf.mxu2 }
  0xd1   :  { %603 = vmatpush.msrb.mxu2 %v532_v60  ;;  %v341_v60 = vadd.f32 %v1110_v1, %v1170_v42  ;;  %v329_v42 = vadd.f32 %v1110_v1, %v1146_v26 }
  0xd2   :  { %v346_v5 = vpop.f32.mrf.mxu0  ;;  %v1191_v6 = vpop.f32.mrf.mxu3 }
  0xd3   :  { %604 = vmatpush.msrb.mxu2 %v531_v63  ;;  %v347_v53 = vadd.f32 %v1110_v1, %v346_v5  ;;  %v335_v5 = vadd.f32 %v1110_v1, %v1158_v34 }
  0xd5   :  { %605 = vmatpush.msrb.mxu2 %v530_v4  ;;  %v518_v61 = vmax.f32 %v347_v53, 0.0  ;;  %v517_v4 = vmax.f32 %v344_v57, 0.0 }
  0xd7   :  { %606 = vmatpush.msrb.mxu2 %v529_v8 }
  0xd8   :  { %v1193_v12 = vpop.f32.mrf.mxu2 }
  0xd9   :  { %607 = vmatpush.msrb.mxu2 %v528_v9 }
  0xda   :  { %v349_v7 = vpop.f32.mrf.mxu0  ;;  %v1195_v13 = vpop.f32.mrf.mxu3 }
  0xdb   :  { %v350_v49 = vadd.f32 %v1110_v1, %v349_v7  ;;  %v516_v7 = vmax.f32 %v341_v60, 0.0 }
  0xdd   :  { %v519_v58 = vmax.f32 %v350_v49, 0.0 }
  0xe0   :  { %v1197_v14 = vpop.f32.mrf.mxu2 }
  0xe2   :  { %v352_v15 = vpop.f32.mrf.mxu0  ;;  %v1199_v62 = vpop.f32.mrf.mxu3 }
  0xe3   :  { %v353_v45 = vadd.f32 %v1110_v1, %v352_v15  ;;  %v515_v15 = vmax.f32 %v338_v3, 0.0  ;;  %v508_v3 = vmax.f32 %v317_v10, 0.0 }
  0xe5   :  { %v520_v56 = vmax.f32 %v353_v45, 0.0 }
  0xe8   :  { %v1201_v16 = vpop.f32.mrf.mxu2 }
  0xea   :  { %v355_v19 = vpop.f32.mrf.mxu0  ;;  %v1203_v20 = vpop.f32.mrf.mxu3 }
  0xeb   :  { %v356_v40 = vadd.f32 %v1110_v1, %v355_v19  ;;  %v514_v19 = vmax.f32 %v335_v5, 0.0 }
  0xed   :  { %v521_v50 = vmax.f32 %v356_v40, 0.0  ;;  %v512_v40 = vmax.f32 %v329_v42, 0.0 }
  0xf0   :  { %v1205_v21 = vpop.f32.mrf.mxu2 }
  0xf2   :  { %v358_v22 = vpop.f32.mrf.mxu0  ;;  %v1207_v23 = vpop.f32.mrf.mxu3 }
  0xf3   :  { %v359_v32 = vadd.f32 %v1110_v1, %v358_v22  ;;  %v326_v22 = vadd.f32 %v1110_v1, %v1135_v17 }
  0xf5   :  { %v522_v46 = vmax.f32 %v359_v32, 0.0  ;;  %v511_v17 = vmax.f32 %v326_v22, 0.0 }
  0xf8   :  { %v445_v24 = vpop.f32.mrf.mxu2 }
  0xf9   :  { %v446_v49 = vadd.f32 %v1110_v1, %v445_v24 }
  0xfa   :  { %v361_v28 = vpop.f32.mrf.mxu0  ;;  %v1213_v47 = vpop.f32.mrf.mxu3 }
  0xfb   :  { %v362_v36 = vadd.f32 %v1110_v1, %v361_v28  ;;  %v513_v28 = vmax.f32 %v332_v54, 0.0  ;;  %v551_v24 = vmax.f32 %v446_v49, 0.0 }
  0xfd   :  { %v523_v44 = vmax.f32 %v362_v36, 0.0 }
  0xff   :  { %576 = vmatpush.msrb.mxu1 %v523_v44 }
 0x100   :  { %v448_v48 = vpop.f32.mrf.mxu2 }
 0x101   :  { %577 = vmatpush.msrb.mxu1 %v522_v46  ;;  %v449_v44 = vadd.f32 %v1110_v1, %v448_v48  ;;  %v320_v46 = vadd.f32 %v1110_v1, %v1112_v2  ;;  %v443_v48 = vadd.f32 %v1110_v1, %v1205_v21  ;;  %v440_v2 = vadd.f32 %v1110_v1, %v1201_v16 }
 0x102   :  { %v1216_v52 = vpop.f32.mrf.mxu0  ;;  %v502_v8 = vpop.f32.mrf.mxu3  ;;  %v437_v21 = vadd.f32 %v1110_v1, %v1197_v14  ;;  %v434_v16 = vadd.f32 %v1110_v1, %v1193_v12  ;;  %v497_v14 = vadd.f32 %v1110_v1, %v1207_v23 }
 0x103   :  { %578 = vmatpush.msrb.mxu1 %v521_v50  ;;  %v552_v57 = vmax.f32 %v449_v44, 0.0  ;;  %v549_v54 = vmax.f32 %v440_v2, 0.0  ;;  %v365_v12 = vadd.f32 %v1110_v1, %v1216_v52  ;;  %v425_v52 = vadd.f32 %v1110_v1, %v1168_v41 }
 0x104   :  { %v548_v22 = vmax.f32 %v437_v21, 0.0  ;;  %v547_v23 = vmax.f32 %v434_v16, 0.0  ;;  %v422_v41 = vadd.f32 %v1110_v1, %v1162_v37  ;;  %v416_v37 = vadd.f32 %v1110_v1, %v1150_v29 }
 0x105   :  { %579 = vmatpush.msrb.mxu1 %v520_v56  ;;  %v510_v56 = vmax.f32 %v323_v30, 0.0  ;;  %v488_v30 = vadd.f32 %v1110_v1, %v1195_v13  ;;  %v419_v13 = vadd.f32 %v1110_v1, %v1156_v33  ;;  %v413_v33 = vadd.f32 %v1110_v1, %v1144_v25  ;;  %v574_v25 = vld [vmem:[%s1341_s3 + $0x10] sm:$0xff] }
 0x106   :  { %v473_v29 = vadd.f32 %v1110_v1, %v1160_v35  ;;  %v467_v35 = vadd.f32 %v1110_v1, %v1148_v27  ;;  %v461_v27 = vadd.f32 %v1110_v1, %v1127_v11 }
 0x107   :  { %580 = vmatpush.msrb.mxu1 %v519_v58  ;;  %v509_v58 = vmax.f32 %v320_v46, 0.0  ;;  %v544_v46 = vmax.f32 %v425_v52, 0.0  ;;  %v565_v49 = vmax.f32 %v488_v30, 0.0  ;;  %v542_v10 = vmax.f32 %v419_v13, 0.0 }
 0x108   :  { %v451_v63 = vpop.f32.mrf.mxu2 }
 0x109   :  { %581 = vmatpush.msrb.mxu1 %v518_v61  ;;  %v452_v32 = vadd.f32 %v1110_v1, %v451_v63  ;;  %v503_v61 = vadd.f32 %v1110_v1, %v502_v8 }
 0x10a   :  { %v367_v9 = vpop.f32.mrf.mxu0  ;;  %v505_v45 = vpop.f32.mrf.mxu3 }
 0x10b   :  { %582 = vmatpush.msrb.mxu1 %v517_v4  ;;  %v553_v50 = vmax.f32 %v452_v32, 0.0  ;;  %v506_v53 = vadd.f32 %v1110_v1, %v505_v45  ;;  %v550_v4 = vmax.f32 %v443_v48, 0.0  ;;  %v368_v8 = vadd.f32 %v1110_v1, %v367_v9 }
 0x10c   :  { %v541_v48 = vmax.f32 %v416_v37, 0.0 }
 0x10d   :  { %583 = vmatpush.msrb.mxu1 %v516_v7  ;;  %v571_v63 = vmax.f32 %v506_v53, 0.0  ;;  %v500_v7 = vadd.f32 %v1110_v1, %v1213_v47  ;;  %v494_v47 = vadd.f32 %v1110_v1, %v1203_v20  ;;  %v525_v32 = vmax.f32 %v368_v8, 0.0 }
 0x10e   :  { %v524_v20 = vmax.f32 %v365_v12, 0.0 }
 0x10f   :  { %584 = vmatpush.msrb.mxu1 %v515_v15  ;;  %v569_v9 = vmax.f32 %v500_v7, 0.0 }
 0x110   :  { %v454_v38 = vpop.f32.mrf.mxu2 }
 0x111   :  { %v455_v34 = vadd.f32 %v1110_v1, %v454_v38  ;;  %585 = vmatpush.msrb.mxu1 %v514_v19  ;;  %v570_v19 = vmax.f32 %v503_v61, 0.0  ;;  %v431_v38 = vadd.f32 %v1110_v1, %v1187_v0  ;;  %v491_v0 = vadd.f32 %v1110_v1, %v1199_v62  ;;  %v572_v62 = vld [vmem:[%s1341_s3] sm:$0xff] }
 0x112   :  { %v370_v36 = vpop.f32.mrf.mxu0 }
 0x113   :  { %v554_v26 = vmax.f32 %v455_v34, 0.0  ;;  %586 = vmatpush.msrb.mxu1 %v513_v28  ;;  %v371_v60 = vadd.f32 %v1110_v1, %v370_v36  ;;  %v428_v28 = vadd.f32 %v1110_v1, %v1178_v51  ;;  %v568_v34 = vmax.f32 %v497_v14, 0.0  ;;  %v573_v51 = vld [vmem:[%s1341_s3 + $0x8] sm:$0xff] }
 0x114   :  { %v546_v36 = vmax.f32 %v431_v38, 0.0  ;;  %v566_v45 = vmax.f32 %v491_v0, 0.0  ;;  %v805_v38 = vld [vmem:[%s1345_s5] ss:$0 sm:$0xff] }
 0x115   :  { %587 = vmatpush.msrb.mxu1 %v512_v40  ;;  %617 = vmatpush.msrb.mxu3 %v554_v26  ;;  %v526_v15 = vmax.f32 %v371_v60, 0.0  ;;  %v567_v40 = vmax.f32 %v494_v47, 0.0  ;;  %v545_v44 = vmax.f32 %v428_v28, 0.0  ;;  %v485_v26 = vadd.f32 %v1110_v1, %v1191_v6  ;;  %v687_v60 = vld [vmem:[%s1342_s7 + $0x8] sm:$0xff] }
 0x116   :  { %v479_v6 = vadd.f32 %v1110_v1, %v1172_v43  ;;  %v540_v43 = vmax.f32 %v413_v33, 0.0 }
 0x117   :  { %588 = vmatpush.msrb.mxu1 %v511_v17  ;;  %618 = vmatpush.msrb.mxu3 %v553_v50  ;;  %v482_v17 = vadd.f32 %v1110_v1, %v1181_v55  ;;  %v543_v50 = vmax.f32 %v422_v41, 0.0  ;;  %v564_v53 = vmax.f32 %v485_v26, 0.0  ;;  %v476_v55 = vadd.f32 %v1110_v1, %v1166_v39  ;;  %v688_v39 = vld [vmem:[%s1342_s7 + $0x10] sm:$0xff] }
 0x119   :  { %589 = vmatpush.msrb.mxu1 %v510_v56  ;;  %619 = vmatpush.msrb.mxu3 %v552_v57  ;;  %v563_v56 = vmax.f32 %v482_v17, 0.0  ;;  %v562_v57 = vmax.f32 %v479_v6, 0.0  ;;  %v561_v2 = vmax.f32 %v476_v55, 0.0 }
 0x11a   :  { %v373_v59 = vpop.f32.mrf.mxu0 }
 0x11b   :  { %590 = vmatpush.msrb.mxu1 %v509_v58  ;;  %620 = vmatpush.msrb.mxu3 %v551_v24  ;;  %v374_v5 = vadd.f32 %v1110_v1, %v373_v59  ;;  %v470_v58 = vadd.f32 %v1110_v1, %v1154_v31  ;;  %v560_v24 = vmax.f32 %v473_v29, 0.0  ;;  %v464_v31 = vadd.f32 %v1110_v1, %v1137_v18  ;;  %v656_v1 = vld [vmem:[%s1346_s4] sm:$0xff] }
 0x11c   :  { %v558_v59 = vmax.f32 %v467_v35, 0.0  ;;  %v556_v18 = vmax.f32 %v461_v27, 0.0 }
 0x11d   :  { %591 = vmatpush.msrb.mxu1 %v508_v3  ;;  %621 = vmatpush.msrb.mxu3 %v550_v4  ;;  %v527_v42 = vmax.f32 %v374_v5, 0.0  ;;  %v559_v61 = vmax.f32 %v470_v58, 0.0  ;;  %v685_v3 = vld [vmem:[%s1343_s6] sm:$0xff]  ;;  %v557_v21 = vmax.f32 %v464_v31, 0.0  ;;  %v575_v4 = vld [vmem:[%s1341_s3 + $0x18] sm:$0xff]  ;;  %s806_s3 = smov 32  }
 0x11e   :  { %592 = vmatmul.f32.vlgmr.msrb.gmra.mxu1 %v572_v62 }
 0x11f   :  { %636 = vmatpush.msra.mxu1 %v571_v63  ;;  %622 = vmatpush.msrb.mxu3 %v549_v54  ;;  %v686_v63 = vld [vmem:[%s1342_s7] sm:$0xff] }
 0x120   :  { %608 = vmatpush.msrb.mxu2 %v527_v42 }
 0x121   :  { %637 = vmatpush.msra.mxu1 %v570_v19  ;;  %623 = vmatpush.msrb.mxu3 %v548_v22 }
 0x122   :  { %609 = vmatpush.msrb.mxu2 %v526_v15  ;;  %v804_v15 = vld [vmem:[%s1344_s8] ss:$0 sm:$0xff] }
 0x123   :  { %638 = vmatpush.msra.mxu1 %v569_v9  ;;  %624 = vmatpush.msrb.mxu3 %v547_v23 }
 0x124   :  { %610 = vmatpush.msrb.mxu2 %v525_v32 }
 0x125   :  { %639 = vmatpush.msra.mxu1 %v568_v34  ;;  %625 = vmatpush.msrb.mxu3 %v546_v36 }
 0x126   :  { %611 = vmatpush.msrb.mxu2 %v524_v20 }
 0x127   :  { %640 = vmatpush.msra.mxu1 %v567_v40  ;;  %612 = vmatmul.f32.vlgmr.msrb.gmra.mxu2 %v573_v51 }
 0x128   :  { %626 = vmatpush.msrb.mxu3 %v545_v44  ;;  %680 = vmatpush.msra.mxu2 %v656_v1 }
 0x129   :  { %641 = vmatpush.msra.mxu1 %v566_v45 }
 0x12a   :  { %627 = vmatpush.msrb.mxu3 %v544_v46 }
 0x12b   :  { %642 = vmatpush.msra.mxu1 %v565_v49 }
 0x12c   :  { %628 = vmatpush.msrb.mxu3 %v543_v50 }
 0x12d   :  { %643 = vmatpush.msra.mxu1 %v564_v53 }
 0x12e   :  { %629 = vmatpush.msrb.mxu3 %v542_v10 }
 0x12f   :  { %644 = vmatpush.msra.mxu1 %v563_v56 }
 0x130   :  { %630 = vmatpush.msrb.mxu3 %v541_v48 }
 0x131   :  { %645 = vmatpush.msra.mxu1 %v562_v57 }
 0x132   :  { %631 = vmatpush.msrb.mxu3 %v540_v43 }
 0x133   :  { %646 = vmatpush.msra.mxu1 %v561_v2  ;;  %632 = vmatmul.f32.vlgmr.msrb.gmra.mxu3 %v574_v25 }
 0x134   :  { %710 = vmatpush.msra.mxu3 %v688_v39 }
 0x135   :  { %647 = vmatpush.msra.mxu1 %v560_v24 }
 0x136   :  { %711 = vmatpush.msra.mxu3 %v687_v60 }
 0x137   :  { %648 = vmatpush.msra.mxu1 %v559_v61 }
 0x138   :  { %712 = vmatpush.msra.mxu3 %v686_v63 }
 0x139   :  { %649 = vmatpush.msra.mxu1 %v558_v59 }
 0x13b   :  { %650 = vmatpush.msra.mxu1 %v557_v21  ;;  %795 = vmatmul.msk.f32.vlgmr.msra.gmra.mxu3 %vm693_vm2, %v685_v3 }
 0x13d   :  { %651 = vmatpush.msra.mxu1 %v556_v18 }
 0x13e   :  { %652 = vmatmul.f32.vlgmr.msra.gmra.mxu1 %v575_v4 }
 0x19b   :  { %v593_v11 = vpop.f32.mrf.mxu1 }
 0x1aa   :  { %v613_v5 = vpop.f32.mrf.mxu2 }
 0x1ab   :  { %v614_v16 = vadd.f32 %v613_v5, %v593_v11 }
 0x1b6   :  { %v633_v7 = vpop.f32.mrf.mxu3 }
 0x1b7   :  { %v634_v54 = vadd.f32 %v633_v7, %v614_v16 }
 0x1bb   :  { %v653_v8 = vpop.f32.mrf.mxu1 }
 0x1bc   :  { %v654_v42 = vadd.f32 %v653_v8, %v634_v54 }
 0x1be   :  { %794 = vmatmul.msk.f32.vlgmr.msra.gmra.mxu2 %vm661_vm3, %v654_v42  ;;  %v714_v14 = vpop.f32.mrf.mxu3 }
 0x1bf   :  { %v715_v19 = vadd.f32 %v804_v15, %v714_v14 }
 0x1c1   :  { %720 = vrot.lane.b32.xlu0 %v715_v19, %s806_s3 }
 0x233   :  { %v721_v47 = vpop.permute.xlu0 %720 }
 0x241   :  { %v682_v22 = vpop.f32.mrf.mxu2 }
 0x242   :  { %v683_v12 = vadd.f32 %v805_v38, %v682_v22 }
 0x244   :  { %718 = vst.msk [vmem:[%s1347_s9] sm:$0xff] %vm717_vm4, %v683_v12 }
 0x245   :  { %724 = vst.msk [vmem:[%s1347_s9] sm:$0xff] %vm723_vm5, %v721_v47 }

</bundles_post_ra>
